<compile_context>
chip_gen: v5e
topology: v5e:2x2
jax: 0.10.0
libtpu: 0.0.40
codegen_flags: <defaults>
</compile_context>

<pallas_src>
import jax
import jax.numpy as jnp
from jax import lax
from jax.experimental import pallas as pl
from jax.experimental.pallas import tpu as pltpu


# --------------------------------------------------------------------------- #
# Kernel
# --------------------------------------------------------------------------- #
def _make_tga_kernel(n_chunks, chunk):
    """Kernel over one (C_sf, TN) block, computed in `chunk`-lane sub-slabs."""

    def tga_kernel(sf_ref, tb1_ref, w1_ref, w2_ref, b2_ref, w3_ref, b3_ref,
                   out_ref):
        # Small, block-invariant operands: load once per grid step.
        w1 = w1_ref[...]            # (H1, C_sf)   f32 or bf16
        w2 = w2_ref[...]            # (H2, H1)     f32 or bf16
        b2 = b2_ref[...]            # (H2, 1)      f32
        w3 = w3_ref[...]            # (H2, 1)      f32  (pre-transposed)
        tb1 = tb1_ref[...]          # (H1, 1)      f32  per-batch rank-1 bias
        b3 = b3_ref[0, 0]           # scalar       f32  (SMEM)

        def body(c, carry):
            off = pl.multiple_of(c * chunk, chunk)

            # Layer 1: relu(w1_sf @ sf + tb1).  MXU, f32 accumulation.
            sf = sf_ref[:, pl.ds(off, chunk)]                     # (C_sf, chunk)
            h1 = jnp.maximum(
                jnp.dot(w1, sf.astype(w1.dtype),
                        preferred_element_type=jnp.float32) + tb1, 0.0)

            # Layer 2: relu(w2 @ h1 + b2).
            h2 = jnp.maximum(
                jnp.dot(w2, h1.astype(w2.dtype),
                        preferred_element_type=jnp.float32) + b2, 0.0)

            # Layer 3: single-row output -> VPU multiply + sublane reduce
            # (skip a 1-row MXU matmul).
            logits = jnp.sum(w3 * h2, axis=0, keepdims=True) + b3
            att = jax.nn.sigmoid(logits)                          # (1, chunk)

            # Re-read sf from VMEM (cheap vld) instead of keeping it live
            # across both matmuls; write the lane-dense output sub-slab.
            sf_again = sf_ref[:, pl.ds(off, chunk)]
            out_ref[:, pl.ds(off, chunk)] = (
                att * sf_again.astype(jnp.float32)).astype(out_ref.dtype)
            return carry

        lax.fori_loop(0, n_chunks, body, 0, unroll=True)

    return tga_kernel


# --------------------------------------------------------------------------- #
# Tiling helpers
# --------------------------------------------------------------------------- #
def _round_up(x, m):
    return pl.cdiv(x, m) * m


def _round_down(x, m):
    return max(m, (x // m) * m)


def _derive_tile_n(N, B, c_sf, in_itemsize, out_itemsize,
                   max_tile_n, vmem_budget_bytes):
    """Largest lane tile (multiple of 128, preferably 512) that fits the
    VMEM budget, capped at max_tile_n, while keeping >= 2 grid steps."""
    n_round = _round_up(N, 128)
    # Double-buffered sf-in + out blocks dominate the per-step VMEM footprint.
    bytes_per_lane = 2 * c_sf * (in_itemsize + out_itemsize)
    tn_budget = _round_down(max(128, vmem_budget_bytes // bytes_per_lane), 128)
    tn = min(n_round, max_tile_n, tn_budget)
    if tn >= 512:
        tn = _round_down(tn, 512)
    # Keep at least 2 "parallel" grid steps so both v7x TensorCores get work.
    if B * pl.cdiv(N, tn) < 2 and n_round > 128:
        tn = _round_down(n_round // 2, 128)
    return tn


def _chunk_for(tn):
    if tn % 512 == 0:
        return 512
    if tn % 256 == 0:
        return 256
    return 128


# --------------------------------------------------------------------------- #
# Wrapper
# --------------------------------------------------------------------------- #
def tga_forward(sf, tf, params, *,
                tile_n=None,
                max_tile_n=8192,
                storage_dtype=None,
                compute_dtype=None,
                vmem_budget_bytes=20 * 1024 * 1024,
                vmem_limit_bytes=32 * 1024 * 1024):
    """sf: (B, C_sf, N), tf: (B, C_tf, M) -> (B, C_sf, N).

    storage_dtype: HBM dtype for sf / output (e.g. jnp.bfloat16 halves the
        dominant HBM traffic of this bandwidth-bound kernel).  The MXU and
        elementwise math stay f32 unless compute_dtype is also set.
    compute_dtype: optional MXU-input dtype for the weights (accumulation is
        always f32)."""
    B, C_sf, N = sf.shape
    w1, b1, w2, b2, w3, b3 = params
    H1, H2 = w1.shape[0], w2.shape[0]

    # --- hoisted out of the kernel -----------------------------------------
    # Split conv1 over the concat axis; the pooled-template branch reduces to
    # a per-batch rank-1 bias (the max-pool itself is O(C_tf*M), trivial XLA).
    w1_sf = w1[:, :C_sf]                                   # (H1, C_sf)
    w1_tf = w1[:, C_sf:]                                   # (H1, C_tf)
    tf_pool = jnp.max(tf, axis=2)                          # (B, C_tf)
    tb1 = ((tf_pool @ w1_tf.T)[..., None]
           + b1[None]).astype(jnp.float32)                 # (B, H1, 1)

    # HBM storage dtype for the dominant traffic (sf read + output write).
    if storage_dtype is not None:
        sf_store = sf.astype(storage_dtype)
        out_dtype = storage_dtype
    else:
        sf_store = sf
        out_dtype = sf.dtype

    # MXU input dtype for the (kilobyte-scale) weights.
    if compute_dtype is not None:
        w1_sf = w1_sf.astype(compute_dtype)
        w2c = w2.astype(compute_dtype)
    else:
        w1_sf = w1_sf.astype(jnp.float32)
        w2c = w2.astype(jnp.float32)

    # Layer-3 / elementwise operands stay f32 (v5e has no bf16 VPU/EUP path).
    w3c = w3.T.astype(jnp.float32)                         # (H2, 1)
    b2c = b2.astype(jnp.float32)                           # (H2, 1)
    b3c = b3.astype(jnp.float32).reshape(1, 1)             # (1, 1) -> SMEM

    # --- tiling --------------------------------------------------------------
    if tile_n is not None:
        TN = _round_down(_round_up(tile_n, 128), 128)
    else:
        TN = _derive_tile_n(N, B, C_sf,
                            jnp.dtype(sf_store.dtype).itemsize,
                            jnp.dtype(out_dtype).itemsize,
                            max_tile_n, vmem_budget_bytes)

    num_tiles = pl.cdiv(N, TN)
    N_pad = num_tiles * TN
    if N_pad != N:
        # Zero-pad so every output block stays lane-dense (unmasked vst).
        sf_store = jnp.pad(sf_store, ((0, 0), (0, 0), (0, N_pad - N)))

    chunk = min(_chunk_for(TN), TN)
    n_chunks = TN // chunk

    def whole(arr):  # batch/tile-invariant operand, VMEM-resident
        return pl.BlockSpec(arr.shape, lambda b, n: (0,) * arr.ndim)

    out = pl.pallas_call(
        _make_tga_kernel(n_chunks, chunk),
        out_shape=jax.ShapeDtypeStruct((B, C_sf, N_pad), out_dtype),
        grid_spec=pltpu.PrefetchScalarGridSpec(
            num_scalar_prefetch=0,
            grid=(B, num_tiles),
            in_specs=[
                pl.BlockSpec((None, C_sf, TN), lambda b, n: (b, 0, n)),  # sf
                pl.BlockSpec((None, H1, 1), lambda b, n: (b, 0, 0)),     # tb1
                whole(w1_sf),                                            # w1_sf
                whole(w2c),                                              # w2
                whole(b2c),                                              # b2
                whole(w3c),                                              # w3^T
                pl.BlockSpec(memory_space=pltpu.MemorySpace.SMEM),       # b3
            ],
            out_specs=pl.BlockSpec((None, C_sf, TN), lambda b, n: (b, 0, n)),
        ),
        compiler_params=pltpu.CompilerParams(
            dimension_semantics=("parallel", "parallel"),
            vmem_limit_bytes=vmem_limit_bytes),
    )(sf_store, tb1, w1_sf, w2c, b2c, w3c, b3c)

    if N_pad != N:
        out = out[:, :, :N]
    return out


# --------------------------------------------------------------------------- #
# Parameter construction / reference
# --------------------------------------------------------------------------- #
def fold_bn(w, b, gamma, beta, mean, var, eps=1e-5):
    """Fold inference-mode BatchNorm1d into a preceding 1x1 conv."""
    scale = gamma / jnp.sqrt(var + eps)
    return w * scale[:, None], (b - mean) * scale + beta


def make_params(key, sf_csize, tf_csize):
    c_in = sf_csize + tf_csize
    h1, h2 = sf_csize, sf_csize // 2
    ks = jax.random.split(key, 14)

    def u(k, shape, s=0.1):
        return jax.random.uniform(k, shape, jnp.float32, -s, s)

    # conv1 + bn1
    w1 = u(ks[0], (h1, c_in)); b1 = u(ks[1], (h1,))
    g1 = 1.0 + u(ks[2], (h1,)); be1 = u(ks[3], (h1,))
    m1 = u(ks[4], (h1,)); v1 = 1.0 + jnp.abs(u(ks[5], (h1,)))
    w1, b1 = fold_bn(w1, b1, g1, be1, m1, v1)
    # conv2 + bn2
    w2 = u(ks[6], (h2, h1)); b2 = u(ks[7], (h2,))
    g2 = 1.0 + u(ks[8], (h2,)); be2 = u(ks[9], (h2,))
    m2 = u(ks[10], (h2,)); v2 = 1.0 + jnp.abs(u(ks[11], (h2,)))
    w2, b2 = fold_bn(w2, b2, g2, be2, m2, v2)
    # conv3 (sigmoid head, no BN)
    w3 = u(ks[12], (1, h2)); b3 = u(ks[13], (1,))

    return (w1, b1.reshape(h1, 1),
            w2, b2.reshape(h2, 1),
            w3, b3.reshape(1, 1))


def tga_reference(sf, tf, params):
    """Pure-JAX reference mirroring the PyTorch forward (BN folded)."""
    w1, b1, w2, b2, w3, b3 = params
    tf_pool = jnp.max(tf, axis=2, keepdims=True)
    tf_exp = jnp.broadcast_to(tf_pool, (tf.shape[0], tf.shape[1], sf.shape[2]))
    tps = jnp.concatenate([sf, tf_exp], axis=1)
    h1 = jax.nn.relu(jnp.einsum('oc,bcn->bon', w1, tps) + b1[None])
    h2 = jax.nn.relu(jnp.einsum('oc,bcn->bon', w2, h1) + b2[None])
    att = jax.nn.sigmoid(jnp.einsum('oc,bcn->bon', w3, h2) + b3[None])
    return att * sf


# --------------------------------------------------------------------------- #
# Self-test
# --------------------------------------------------------------------------- #
if __name__ == "__main__":
    B, sf_csize, tf_csize, N, M = 2, 32, 32, 1024, 128

    key = jax.random.PRNGKey(0)
    k_sf, k_tf, k_p = jax.random.split(key, 3)
    sf = jax.random.normal(k_sf, (B, sf_csize, N), jnp.float32)
    tf = jax.random.normal(k_tf, (B, tf_csize, M), jnp.float32)
    params = make_params(k_p, sf_csize, tf_csize)

    ref = jax.block_until_ready(tga_reference(sf, tf, params))

    # f32 path (matches the PyTorch forward, modulo FP ordering).
    out = jax.block_until_ready(tga_forward(sf, tf, params))
    assert out.shape == (B, sf_csize, N)
    assert bool(jnp.allclose(out, ref, atol=1e-4, rtol=1e-4))

    # bf16-storage path: sf / output live in bf16 in HBM (halves the dominant
    # HBM traffic of this bandwidth-bound kernel); MXU + elementwise stay f32.
    out_bf16 = jax.block_until_ready(
        tga_forward(sf, tf, params, storage_dtype=jnp.bfloat16))
    assert out_bf16.shape == (B, sf_csize, N)
    assert float(jnp.max(jnp.abs(out_bf16.astype(jnp.float32) - ref))) < 0.1

    # Ragged-N path: N not a multiple of 128 -> wrapper pads to a lane-dense
    # tile and slices the result back (no masked partial stores in-kernel).
    N2 = 1000
    sf2 = sf[:, :, :N2]
    ref2 = jax.block_until_ready(tga_reference(sf2, tf, params))
    out2 = jax.block_until_ready(tga_forward(sf2, tf, params))
    assert out2.shape == (B, sf_csize, N2)
    assert bool(jnp.allclose(out2, ref2, atol=1e-4, rtol=1e-4))

    print("KERNEL_OK")
</pallas_src>

<mosaic_0001>
module attributes {stable_mosaic.version = 11 : i64} {
  func.func @tga_kernel(%arg0: i32, %arg1: i32, %arg2: memref<1x32x1024xf32, #tpu.memory_space<vmem>>, %arg3: memref<1x32x1xf32, #tpu.memory_space<vmem>>, %arg4: memref<32x32xf32, #tpu.memory_space<vmem>>, %arg5: memref<16x32xf32, #tpu.memory_space<vmem>>, %arg6: memref<16x1xf32, #tpu.memory_space<vmem>>, %arg7: memref<16x1xf32, #tpu.memory_space<vmem>>, %arg8: memref<1x1xf32, #tpu.memory_space<smem>>, %arg9: memref<1x32x1024xf32, #tpu.memory_space<vmem>>) attributes {dimension_semantics = [#tpu.dimension_semantics<parallel>, #tpu.dimension_semantics<parallel>], iteration_bounds = array<i64: 2, 1>, scalar_prefetch = 0 : i64, scratch_operands = 0 : i64, tpu.core_type = #tpu.core_type<tc>, window_params = [{transform_indices = @transform_0, window_bounds = array<i64: 1, 32, 1024>}, {transform_indices = @transform_1, window_bounds = array<i64: 1, 32, 1>}, {pipeline_mode = #tpu.pipeline_mode<synchronous>, transform_indices = @transform_2, window_bounds = array<i64: 32, 32>}, {pipeline_mode = #tpu.pipeline_mode<synchronous>, transform_indices = @transform_3, window_bounds = array<i64: 16, 32>}, {pipeline_mode = #tpu.pipeline_mode<synchronous>, transform_indices = @transform_4, window_bounds = array<i64: 16, 1>}, {pipeline_mode = #tpu.pipeline_mode<synchronous>, transform_indices = @transform_5, window_bounds = array<i64: 16, 1>}, {transform_indices = @transform_6, window_bounds = array<i64: 1, 1>}, {transform_indices = @transform_7, window_bounds = array<i64: 1, 32, 1024>}]} {
    %c0 = arith.constant 0 : index
    %c0_0 = arith.constant 0 : index
    %0 = vector.load %arg4[%c0, %c0_0] : memref<32x32xf32, #tpu.memory_space<vmem>>, vector<32x32xf32>
    %c0_1 = arith.constant 0 : index
    %c0_2 = arith.constant 0 : index
    %1 = vector.load %arg5[%c0_1, %c0_2] : memref<16x32xf32, #tpu.memory_space<vmem>>, vector<16x32xf32>
    %c0_3 = arith.constant 0 : index
    %c0_4 = arith.constant 0 : index
    %2 = vector.load %arg6[%c0_3, %c0_4] : memref<16x1xf32, #tpu.memory_space<vmem>>, vector<16x1xf32>
    %c0_5 = arith.constant 0 : index
    %c0_6 = arith.constant 0 : index
    %3 = vector.load %arg7[%c0_5, %c0_6] : memref<16x1xf32, #tpu.memory_space<vmem>>, vector<16x1xf32>
    %c0_7 = arith.constant 0 : index
    %c0_8 = arith.constant 0 : index
    %c0_9 = arith.constant 0 : index
    %4 = vector.load %arg3[%c0_7, %c0_8, %c0_9] : memref<1x32x1xf32, #tpu.memory_space<vmem>>, vector<1x32x1xf32>
    %5 = vector.shape_cast %4 : vector<1x32x1xf32> to vector<32x1xf32>
    %c0_10 = arith.constant 0 : index
    %c0_11 = arith.constant 0 : index
    %6 = memref.load %arg8[%c0_10, %c0_11] : memref<1x1xf32, #tpu.memory_space<smem>>
    %c0_i32 = arith.constant 0 : i32
    %c512_i32 = arith.constant 512 : i32
    %7 = arith.muli %c0_i32, %c512_i32 : i32
    %8 = tpu.assume_multiple %7, 512 : i32
    %c0_12 = arith.constant 0 : index
    %c0_13 = arith.constant 0 : index
    %9 = arith.index_cast %8 : i32 to index
    %10 = vector.load %arg2[%c0_12, %c0_13, %9] : memref<1x32x1024xf32, #tpu.memory_space<vmem>>, vector<1x32x512xf32>
    %11 = vector.shape_cast %10 : vector<1x32x512xf32> to vector<32x512xf32>
    %cst = arith.constant dense<0.000000e+00> : vector<32x512xf32>
    %12 = tpu.matmul %0, %11, %cst {dimension_numbers = #tpu.dot_dimension_numbers<[1], [0], [0], [1], [0, 0, 1, 1], [], []>} : vector<32x32xf32>, vector<32x512xf32>, vector<32x512xf32> -> vector<32x512xf32>
    %13 = vector.broadcast %5 : vector<32x1xf32> to vector<32x512xf32>
    %14 = arith.addf %12, %13 : vector<32x512xf32>
    %cst_14 = arith.constant 0.000000e+00 : f32
    %15 = vector.broadcast %cst_14 : f32 to vector<32x512xf32>
    %16 = arith.maximumf %14, %15 : vector<32x512xf32>
    %cst_15 = arith.constant dense<0.000000e+00> : vector<16x512xf32>
    %17 = tpu.matmul %1, %16, %cst_15 {dimension_numbers = #tpu.dot_dimension_numbers<[1], [0], [0], [1], [0, 0, 1, 1], [], []>} : vector<16x32xf32>, vector<32x512xf32>, vector<16x512xf32> -> vector<16x512xf32>
    %18 = vector.broadcast %2 : vector<16x1xf32> to vector<16x512xf32>
    %19 = arith.addf %17, %18 : vector<16x512xf32>
    %cst_16 = arith.constant 0.000000e+00 : f32
    %20 = vector.broadcast %cst_16 : f32 to vector<16x512xf32>
    %21 = arith.maximumf %19, %20 : vector<16x512xf32>
    %22 = vector.broadcast %3 : vector<16x1xf32> to vector<16x512xf32>
    %23 = arith.mulf %22, %21 : vector<16x512xf32>
    %cst_17 = arith.constant dense<0.000000e+00> : vector<512xf32>
    %24 = vector.multi_reduction <add>, %23, %cst_17 [0] : vector<16x512xf32> to vector<512xf32>
    %25 = vector.shape_cast %24 : vector<512xf32> to vector<1x512xf32>
    %26 = vector.broadcast %6 : f32 to vector<1x512xf32>
    %27 = arith.addf %25, %26 : vector<1x512xf32>
    %28 = arith.negf %27 : vector<1x512xf32>
    %29 = math.exp %28 : vector<1x512xf32>
    %cst_18 = arith.constant 1.000000e+00 : f32
    %30 = vector.broadcast %cst_18 : f32 to vector<1x512xf32>
    %31 = arith.addf %30, %29 : vector<1x512xf32>
    %32 = arith.divf %30, %31 : vector<1x512xf32>
    %c0_19 = arith.constant 0 : index
    %c0_20 = arith.constant 0 : index
    %33 = arith.index_cast %8 : i32 to index
    %34 = vector.load %arg2[%c0_19, %c0_20, %33] : memref<1x32x1024xf32, #tpu.memory_space<vmem>>, vector<1x32x512xf32>
    %35 = vector.shape_cast %34 : vector<1x32x512xf32> to vector<32x512xf32>
    %36 = vector.broadcast %32 : vector<1x512xf32> to vector<32x512xf32>
    %37 = arith.mulf %36, %35 : vector<32x512xf32>
    %c0_21 = arith.constant 0 : index
    %c0_22 = arith.constant 0 : index
    %38 = arith.index_cast %8 : i32 to index
    %39 = vector.load %arg9[%c0_21, %c0_22, %38] : memref<1x32x1024xf32, #tpu.memory_space<vmem>>, vector<1x32x512xf32>
    %40 = vector.shape_cast %39 : vector<1x32x512xf32> to vector<32x512xf32>
    %41 = vector.shape_cast %37 : vector<32x512xf32> to vector<1x32x512xf32>
    tpu.vector_store %arg9[%c0_21, %c0_22, %38], %41 {strides = array<i32>} : memref<1x32x1024xf32, #tpu.memory_space<vmem>>, vector<1x32x512xf32>,
    %c1_i32 = arith.constant 1 : i32
    %c512_i32_23 = arith.constant 512 : i32
    %42 = arith.muli %c1_i32, %c512_i32_23 : i32
    %43 = tpu.assume_multiple %42, 512 : i32
    %c0_24 = arith.constant 0 : index
    %c0_25 = arith.constant 0 : index
    %44 = arith.index_cast %43 : i32 to index
    %45 = vector.load %arg2[%c0_24, %c0_25, %44] : memref<1x32x1024xf32, #tpu.memory_space<vmem>>, vector<1x32x512xf32>
    %46 = vector.shape_cast %45 : vector<1x32x512xf32> to vector<32x512xf32>
    %cst_26 = arith.constant dense<0.000000e+00> : vector<32x512xf32>
    %47 = tpu.matmul %0, %46, %cst_26 {dimension_numbers = #tpu.dot_dimension_numbers<[1], [0], [0], [1], [0, 0, 1, 1], [], []>} : vector<32x32xf32>, vector<32x512xf32>, vector<32x512xf32> -> vector<32x512xf32>
    %48 = vector.broadcast %5 : vector<32x1xf32> to vector<32x512xf32>
    %49 = arith.addf %47, %48 : vector<32x512xf32>
    %cst_27 = arith.constant 0.000000e+00 : f32
    %50 = vector.broadcast %cst_27 : f32 to vector<32x512xf32>
    %51 = arith.maximumf %49, %50 : vector<32x512xf32>
    %cst_28 = arith.constant dense<0.000000e+00> : vector<16x512xf32>
    %52 = tpu.matmul %1, %51, %cst_28 {dimension_numbers = #tpu.dot_dimension_numbers<[1], [0], [0], [1], [0, 0, 1, 1], [], []>} : vector<16x32xf32>, vector<32x512xf32>, vector<16x512xf32> -> vector<16x512xf32>
    %53 = vector.broadcast %2 : vector<16x1xf32> to vector<16x512xf32>
    %54 = arith.addf %52, %53 : vector<16x512xf32>
    %cst_29 = arith.constant 0.000000e+00 : f32
    %55 = vector.broadcast %cst_29 : f32 to vector<16x512xf32>
    %56 = arith.maximumf %54, %55 : vector<16x512xf32>
    %57 = vector.broadcast %3 : vector<16x1xf32> to vector<16x512xf32>
    %58 = arith.mulf %57, %56 : vector<16x512xf32>
    %cst_30 = arith.constant dense<0.000000e+00> : vector<512xf32>
    %59 = vector.multi_reduction <add>, %58, %cst_30 [0] : vector<16x512xf32> to vector<512xf32>
    %60 = vector.shape_cast %59 : vector<512xf32> to vector<1x512xf32>
    %61 = vector.broadcast %6 : f32 to vector<1x512xf32>
    %62 = arith.addf %60, %61 : vector<1x512xf32>
    %63 = arith.negf %62 : vector<1x512xf32>
    %64 = math.exp %63 : vector<1x512xf32>
    %cst_31 = arith.constant 1.000000e+00 : f32
    %65 = vector.broadcast %cst_31 : f32 to vector<1x512xf32>
    %66 = arith.addf %65, %64 : vector<1x512xf32>
    %67 = arith.divf %65, %66 : vector<1x512xf32>
    %c0_32 = arith.constant 0 : index
    %c0_33 = arith.constant 0 : index
    %68 = arith.index_cast %43 : i32 to index
    %69 = vector.load %arg2[%c0_32, %c0_33, %68] : memref<1x32x1024xf32, #tpu.memory_space<vmem>>, vector<1x32x512xf32>
    %70 = vector.shape_cast %69 : vector<1x32x512xf32> to vector<32x512xf32>
    %71 = vector.broadcast %67 : vector<1x512xf32> to vector<32x512xf32>
    %72 = arith.mulf %71, %70 : vector<32x512xf32>
    %c0_34 = arith.constant 0 : index
    %c0_35 = arith.constant 0 : index
    %73 = arith.index_cast %43 : i32 to index
    %74 = vector.load %arg9[%c0_34, %c0_35, %73] : memref<1x32x1024xf32, #tpu.memory_space<vmem>>, vector<1x32x512xf32>
    %75 = vector.shape_cast %74 : vector<1x32x512xf32> to vector<32x512xf32>
    %76 = vector.shape_cast %72 : vector<32x512xf32> to vector<1x32x512xf32>
    tpu.vector_store %arg9[%c0_34, %c0_35, %73], %76 {strides = array<i32>} : memref<1x32x1024xf32, #tpu.memory_space<vmem>>, vector<1x32x512xf32>,
    %c2_i32 = arith.constant 2 : i32
    return
  }
  func.func @transform_0(%arg0: i32, %arg1: i32) -> (i32, i32, i32) {
    %c0_i32 = arith.constant 0 : i32
    %c0_i32_0 = arith.constant 0 : i32
    return %arg0, %c0_i32, %arg1 : i32, i32, i32
  }
  func.func @transform_1(%arg0: i32, %arg1: i32) -> (i32, i32, i32) {
    %c0_i32 = arith.constant 0 : i32
    %c0_i32_0 = arith.constant 0 : i32
    %c0_i32_1 = arith.constant 0 : i32
    return %arg0, %c0_i32, %c0_i32_0 : i32, i32, i32
  }
  func.func @transform_2(%arg0: i32, %arg1: i32) -> (i32, i32) {
    %c0_i32 = arith.constant 0 : i32
    %c0_i32_0 = arith.constant 0 : i32
    %c0_i32_1 = arith.constant 0 : i32
    return %c0_i32, %c0_i32_0 : i32, i32
  }
  func.func @transform_3(%arg0: i32, %arg1: i32) -> (i32, i32) {
    %c0_i32 = arith.constant 0 : i32
    %c0_i32_0 = arith.constant 0 : i32
    %c0_i32_1 = arith.constant 0 : i32
    return %c0_i32, %c0_i32_0 : i32, i32
  }
  func.func @transform_4(%arg0: i32, %arg1: i32) -> (i32, i32) {
    %c0_i32 = arith.constant 0 : i32
    %c0_i32_0 = arith.constant 0 : i32
    %c0_i32_1 = arith.constant 0 : i32
    return %c0_i32, %c0_i32_0 : i32, i32
  }
  func.func @transform_5(%arg0: i32, %arg1: i32) -> (i32, i32) {
    %c0_i32 = arith.constant 0 : i32
    %c0_i32_0 = arith.constant 0 : i32
    %c0_i32_1 = arith.constant 0 : i32
    return %c0_i32, %c0_i32_0 : i32, i32
  }
  func.func @transform_6(%arg0: i32, %arg1: i32) -> (i32, i32) {
    %c0_i32 = arith.constant 0 : i32
    %c0_i32_0 = arith.constant 0 : i32
    %c0_i32_1 = arith.constant 0 : i32
    return %c0_i32, %c0_i32_0 : i32, i32
  }
  func.func @transform_7(%arg0: i32, %arg1: i32) -> (i32, i32, i32) {
    %c0_i32 = arith.constant 0 : i32
    %c0_i32_0 = arith.constant 0 : i32
    return %arg0, %c0_i32, %arg1 : i32, i32, i32
  }
}

</mosaic_0001>

<bundles_post_ra>
// kernel: tpu_custom_call.1
= control target key start
LH: loop header
LB: loop body
LE: loop exit
PB: predicated region body
PF: predicated region fallthrough
CT: control target
= control target key end

     0   :  { %s2312_s0 = inlined_call_operand.hbm [shape: f32[2,32,1024], index: 0, kind: input, shape index: {}]   ;;  %s2313_s1 = inlined_call_operand.vmem [shape: f32[2,32,1], index: 1, kind: input, shape index: {}]   ;;  %s2314_s2 = inlined_call_operand.vmem [shape: f32[32,32], index: 2, kind: input, shape index: {}]   ;;  %s2315_s3 = inlined_call_operand.vmem [shape: f32[16,32], index: 3, kind: input, shape index: {}]   ;;  %s2316_s4 = inlined_call_operand.vmem [shape: f32[16,1], index: 4, kind: input, shape index: {}]   ;;  %s2317_s5 = inlined_call_operand.vmem [shape: f32[16,1], index: 5, kind: input, shape index: {}]   ;;  %s2318_s6 = inlined_call_operand.<no memory space> [shape: f32[1,1], index: 6, kind: input, shape index: {}]   ;;  %s2319_s7 = inlined_call_operand.hbm [shape: f32[2,32,1024], index: 7, kind: output, shape index: {}]  }
   0x1   :  { %12 = sst [smem:[#allocation2]] %s2318_s6 }
   0x2   :  { %13 = vsyncpa [#allocation4], 0 }
   0x3   :  { %15 = vsyncpa [#allocation4 + $0x1], 0 }
   0x4   :  { %16 = vsyncpa [#allocation5], 0 }
   0x5   :  { %18 = vsyncpa [#allocation5 + $0x1], 0  ;;  %s1698_s26 = smov 0   ;;  %s1700_s27 = smov 0  }
   0x6   :  { %s1702_s28 = smov 0   ;;  %s1704_s29 = smov 0  }
   0x7   :  { %s1706_s30 = smov 0   ;;  %s1708_s8 = smov 0  }
   0x8 LB: > { %s1326_s6 = sadd.s32 4294967295, %s1648_s8   ;;  %s1327_s9 = sadd.s32 4294967294, %s1648_s8   ;;  %s1648_s8 = sphi %s1708_s8, %s24_s8   ;;  %s1644_s30 = sphi %s1706_s30, %s2358_s30   ;;  %s1640_s29 = sphi %s1704_s29, %s2357_s29   ;;  %s1636_s28 = sphi %s1702_s28, %s2356_s28   ;;  %s1632_s27 = sphi %s1700_s27, %s2355_s27   ;;  %s1628_s26 = sphi %s1698_s26, %s2354_s26  }
   0x9   : > { %s36_s10 = sadd.s32 1, %s1644_s30  ;;  %s45_s11 = sadd.s32 1, %s1636_s28 }
   0xa   : > { %p38_p0 = scmp.ge.s32.totalorder %s36_s10, 2  ;;  %p52_p1 = scmp.ne.s32.totalorder %s1636_s28, %s1632_s27 }
   0xb   : > { %p53_p2 = scmp.eq.s32.totalorder %s1648_s8, 0  ;;  %p58_p3 = scmp.ne.s32.totalorder %s1632_s27, %s1628_s26 }
   0xc   : > { %s2360_s10 = smov (%p38_p0, %s36_s10), 0  ;;  %p59_p5 = scmp.eq.s32.totalorder %s1326_s6, 0 }
   0xd   : > { %2330 = sst [smem:[#allocation9_spill]] %s2360_s10  ;;  %p1739_p4 = por %p53_p2, %p52_p1 }
   0xe   : > { %s40_s13 = ssub.s32 %s1644_s30, %s2360_s10  ;;  %p215_p6 = scmp.eq.s32.totalorder %s1326_s6, 1 }
   0xf   : > { %p43_p7 = scmp.eq.s32.totalorder %s40_s13, 0  ;;  %p1745_p8 = por %p59_p5, %p58_p3 }
  0x10   : > { %p1749_p9 = por %p215_p6, %p52_p1  ;;  %p221_p10 = scmp.eq.s32.totalorder %s1327_s9, 1 }
  0x11   : > { %s1754_s16 = scalar_select %p43_p7, %s1636_s28, %s45_s11  }
  0x12   : > { %p1756_p11 = por %p221_p10, %p58_p3  ;;  %p1329_p12 = scmp.ge.s32.totalorder %s1648_s8, 2 }
  0x13   : > { %p1446_p13 = scmp.lt.s32.totalorder %s1648_s8, 2  ;;  %s256_s18 = sand.u32 1, %s1636_s28  }
  0x14   : > { %s1330_s19 = sshll.u32 %s256_s18, 8  ;;  %s1431_s20 = sshll.u32 %s1644_s30, 8 }
  0x15   : > { %s267_s23 = scalar_lea.hbm %s2312_s0, %s1431_s20  ;;  %s260_s24 = scalar_lea.vmem [#allocation3], %s1330_s19 }
  0x16   : > { %s270_s25 = sshll.u32 %s260_s24, 4  ;;  %s268_s6 = sshll.u32 %s267_s23, 4  ;;  %s271_s25 = int_to_ptr.vmem [resolvable:$true] %s270_s25  ;;  %s269_s6 = int_to_ptr.hbm [resolvable:$true] %s268_s6 }
  0x17   : > { %p1439_p0 = pnand %p1446_p13, %p1739_p4  ;;  %p1333_p1 = scmp.ge.s32.totalorder %s1648_s8, 1 }
  0x18   : > { %s257_s9 = scalar_lea.sflag [#allocation4], %s256_s18  ;;  %s1650_s11 = smov 1024  }
  0x19   : > { %s1651_s13 = smov 64   ;;  %p286_p2 = scmp.lt.s32.totalorder %s1648_s8, 3 }
  0x1a   : > { %1441 = dma.hbm_to_vmem [thread:$0]  (!%p1439_p0), %s269_s6, 4096, %s271_s25, %s257_s9, %s1650_s11, %s1650_s11, %s1651_s13  }
  0x1b   : > { %p287_p3 = pnand %p1333_p1, %p286_p2 }
  0x1d   : > { %290 = sbr.rel (%p287_p3) target bundleno = 604 (0x25c), region = 48 }
  0x22   : > { %s1772_s10 = sand.u32 1, %s1632_s27  }
  0x23   : > { %s1334_s19 = sshll.u32 %s1772_s10, 8  ;;  %s293_s20 = scalar_lea.sflag [#allocation4], %s1772_s10 }
  0x24   : > { %s1778_s12 = scalar_lea.vmem [#allocation3], %s1334_s19 }
  0x25   : > { %1619 = dma.done.wait (%p1745_p8), %s293_s20, 4096  }
  0x26   : > { %1621 = vsyncadd (%p1745_p8), %s293_s20, 4294963200  ;;  %v1652_v0 = vmov 0   ;;  %p334_p4 = scmp.lt.s32.totalorder %s1640_s29, 1  ;;  %v1789_v1 = vld [vmem:[%s1778_s12 + $0xc0] sm:$0xff]  ;;  %v1792_v2 = vld [vmem:[%s1778_s12 + $0xc8] sm:$0xff]  ;;  %vm391_vm0 = vcmask 261120  }
  0x27   : > { %1502 = vset.pattern.permute.xlu1 %v1652_v0  ;;  %1501 = vset.pattern.permute.xlu0 %v1652_v0  ;;  %v1795_v3 = vld [vmem:[%s1778_s12 + $0xd0] sm:$0xff]  ;;  %v1800_v4 = vld [vmem:[%s1778_s12 + $0xd8] sm:$0xff]  ;;  %v1803_v5 = vld [vmem:[%s1778_s12 + $0x80] sm:$0xff]  ;;  %s1210_s25 = scalar_lea.sflag [#allocation5], %s1772_s10  ;;  %s1586_s20 = scalar_lea.hbm %s2319_s7, 512 }
  0x28   : > { %1503 = vset.pattern.permute.xlu2 %v1652_v0  ;;  %s1786_s18 = scalar_select %p334_p4, %s1640_s29, 1  ;;  %416 = vmatpush.msra.mxu0 %v1789_v1  ;;  %v1806_v6 = vld [vmem:[%s1778_s12 + $0x88] sm:$0xff]  ;;  %v1811_v7 = vld [vmem:[%s1778_s12 + $0x90] sm:$0xff]  ;;  %v1814_v8 = vld [vmem:[%s1778_s12 + $0x98] sm:$0xff] }
  0x29   : > { %445 = vmatpush.msra.mxu1 %v1792_v2  ;;  %474 = vmatpush.msra.mxu2 %v1795_v3  ;;  %v1817_v9 = vld [vmem:[%s1778_s12 + $0x40] sm:$0xff]  ;;  %v1823_v10 = vld [vmem:[%s1778_s12 + $0x48] sm:$0xff]  ;;  %v1826_v11 = vld [vmem:[%s1778_s12 + $0x50] sm:$0xff] }
  0x2a   : > { %503 = vmatpush.msra.mxu3 %v1800_v4  ;;  %s1432_s14 = sshll.u32 %s1786_s18, 5  ;;  %417 = vmatpush.msra.mxu0 %v1803_v5  ;;  %v1829_v12 = vld [vmem:[%s1778_s12 + $0x58] sm:$0xff]  ;;  %v1834_v13 = vld [vmem:[%s1778_s12] sm:$0xff]  ;;  %v1837_v14 = vld [vmem:[%s1778_s12 + $0x8] sm:$0xff] }
  0x2b   : > { %446 = vmatpush.msra.mxu1 %v1806_v6  ;;  %475 = vmatpush.msra.mxu2 %v1811_v7  ;;  %v1842_v15 = vld [vmem:[%s1778_s12 + $0x10] sm:$0xff]  ;;  %v1845_v16 = vld [vmem:[%s1778_s12 + $0x18] sm:$0xff]  ;;  %s338_s23 = scalar_lea.vmem %s2313_s1, %s1432_s14  ;;  %v1855_v17 = vld [vmem:[%s2314_s2] sm:$0xff]  ;;  %s2164_s14 = scalar_lea.vmem [#allocation6], %s1334_s19 }
  0x2c   : > { %504 = vmatpush.msra.mxu3 %v1814_v8  ;;  %418 = vmatpush.msra.mxu0 %v1817_v9  ;;  %v351_v18 = vld [vmem:[%s338_s23 + $0x8] sm:$0xff]  ;;  %v353_v19 = vld [vmem:[%s338_s23 + $0x18] sm:$0xff]  ;;  %v350_v21 = vld [vmem:[%s338_s23] sm:$0xff]  ;;  %s1433_s19 = sshll.u32 %s1640_s29, 8 }
  0x2d   : > { %447 = vmatpush.msra.mxu1 %v1823_v10  ;;  %476 = vmatpush.msra.mxu2 %v1826_v11  ;;  %v1872_v20 = vld [vmem:[%s2314_s2 + $0x8] sm:$0xff]  ;;  %v352_v22 = vld [vmem:[%s338_s23 + $0x10] sm:$0xff]  ;;  %v348_v24 = vld [vmem:[%s2317_s5] sm:$0xff]  ;;  %s1223_s22 = scalar_lea.hbm %s2319_s7, %s1433_s19  ;;  %s1224_s23 = sshll.u32 %s2164_s14, 4  ;;  %s1225_s23 = int_to_ptr.vmem [resolvable:$true] %s1224_s23 }
  0x2e   : > { %505 = vmatpush.msra.mxu3 %v1829_v12  ;;  %419 = vmatpush.msra.mxu0 %v1834_v13  ;;  %v1885_v23 = vld [vmem:[%s2314_s2 + $0x10] sm:$0xff]  ;;  %v349_v25 = vld [vmem:[%s2317_s5 + $0x8] sm:$0xff]  ;;  %v1904_v26 = vld [vmem:[%s2314_s2 + $0x18] sm:$0xff]  ;;  %s1226_s24 = sshll.u32 %s1223_s22, 4  ;;  %s1227_s24 = int_to_ptr.hbm [resolvable:$true] %s1226_s24 }
  0x2f   : > { %448 = vmatpush.msra.mxu1 %v1837_v14  ;;  %477 = vmatpush.msra.mxu2 %v1842_v15  ;;  %s1580_s6 = sshra.s32 %s1227_s24, 4  ;;  %s1581_s6 = int_to_ptr.hbm [resolvable:$true] %s1580_s6 }
  0x30   : > { %506 = vmatpush.msra.mxu3 %v1845_v16  ;;  %1338 = vmatmul.msk.f32.vlgmr.msra.gmra.mxu0 %vm391_vm0, %v1855_v17  ;;  %s1582_s9 = scalar_lea.hbm %s1581_s6, 256  ;;  %p1587_p8 = scmp.lt.s32.totalorder %s1581_s6, %s2319_s7 }
  0x31   : > { %1342 = vmatmul.msk.f32.vlgmr.msra.gmra.mxu1 %vm391_vm0, %v1855_v17  ;;  %1346 = vmatmul.msk.f32.vlgmr.msra.gmra.mxu2 %vm391_vm0, %v1855_v17  ;;  %p1583_p5 = scmp.ne.s32.totalorder %s1581_s6, %s1582_s9  ;;  %p1588_p10 = scmp.lt.s32.totalorder %s1586_s20, %s1582_s9 }
  0x32   : > { %1350 = vmatmul.msk.f32.vlgmr.msra.gmra.mxu3 %vm391_vm0, %v1855_v17  ;;  %378 = vperm.xlu1 %1502, %v351_v18  }
  0x33   : > { %388 = vperm.xlu0 %1501, %v353_v19   ;;  %p1584_p6 = pnand %p1583_p5, %p1749_p9  ;;  %p1589_p13 = por %p1588_p10, %p1587_p8 }
  0x35   : > { %p1585_p7 = pneg %p1584_p6 }
  0x37   : > { %p1590_p0 = pnand %p1589_p13, %p1585_p7 }
  0x38   : > { %1339 = vmatmul.msk.f32.gmra.mxu0 %vm391_vm0, %v1872_v20 }
  0x39   : > { %1343 = vmatmul.msk.f32.gmra.mxu1 %vm391_vm0, %v1872_v20  ;;  %1347 = vmatmul.msk.f32.gmra.mxu2 %vm391_vm0, %v1872_v20 }
  0x3a   : > { %1351 = vmatmul.msk.f32.gmra.mxu3 %vm391_vm0, %v1872_v20  ;;  %373 = vperm.xlu1 %1502, %v350_v21  }
  0x3b   : > { %383 = vperm.xlu0 %1501, %v352_v22  }
  0x40   : > { %1340 = vmatmul.msk.f32.gmra.mxu0 %vm391_vm0, %v1885_v23 }
  0x41   : > { %1344 = vmatmul.msk.f32.gmra.mxu1 %vm391_vm0, %v1885_v23  ;;  %1348 = vmatmul.msk.f32.gmra.mxu2 %vm391_vm0, %v1885_v23 }
  0x42   : > { %1352 = vmatmul.msk.f32.gmra.mxu3 %vm391_vm0, %v1885_v23  ;;  %659 = vperm.xlu1 %1502, %v349_v25  }
  0x43   : > { %654 = vperm.xlu0 %1501, %v348_v24  }
  0x48   : > { %1341 = vmatmul.msk.f32.gmra.mxu0 %vm391_vm0, %v1904_v26 }
  0x49   : > { %1345 = vmatmul.msk.f32.gmra.mxu1 %vm391_vm0, %v1904_v26  ;;  %1349 = vmatmul.msk.f32.gmra.mxu2 %vm391_vm0, %v1904_v26 }
  0x4a   : > { %1353 = vmatmul.msk.f32.gmra.mxu3 %vm391_vm0, %v1904_v26 }
  0xa4   : > { %v1916_v38 = vpop.permute.xlu1 %378 }
  0xa5   : > { %v1914_v33 = vpop.permute.xlu0 %388 }
  0xac   : > { %v1926_v52 = vpop.permute.xlu1 %373 }
  0xad   : > { %v421_v27 = vpop.f32.mrf.mxu0  ;;  %v1918_v39 = vpop.permute.xlu0 %383 }
  0xae   : > { %v450_v28 = vpop.f32.mrf.mxu1  ;;  %v422_v55 = vadd.f32 %v421_v27, %v1926_v52  ;;  %v1939_v27 = vld [vmem:[%s2315_s3] sm:$0xff] }
  0xaf   : > { %v451_v56 = vadd.f32 %v450_v28, %v1926_v52 }
  0xb0   : > { %v520_v18 = vmax.f32 %v422_v55, 0.0  ;;  %v2015_v55 = vld [vmem:[%s1778_s12 + $0x78] sm:$0xff] }
  0xb1   : > { %v521_v19 = vmax.f32 %v451_v56, 0.0  ;;  %2341 = vst [vmem:[#allocation16_spill] sm:$0xff] %v2015_v55  ;;  %v2022_v56 = vld [vmem:[%s1778_s12 + $0x30] sm:$0xff] }
  0xb2   : > { %2342 = vst [vmem:[#allocation17_spill] sm:$0xff] %v2022_v56 }
  0xb4   : > { %v479_v29 = vpop.f32.mrf.mxu2 }
  0xb5   : > { %v508_v30 = vpop.f32.mrf.mxu3  ;;  %v424_v31 = vpop.f32.mrf.mxu0  ;;  %v480_v28 = vadd.f32 %v479_v29, %v1926_v52 }
  0xb6   : > { %v453_v32 = vpop.f32.mrf.mxu1  ;;  %v425_v48 = vadd.f32 %v424_v31, %v1916_v38  ;;  %v509_v31 = vadd.f32 %v508_v30, %v1926_v52  ;;  %v1954_v30 = vld [vmem:[%s1778_s12 + $0xa0] sm:$0xff] }
  0xb7   : > { %v454_v49 = vadd.f32 %v453_v32, %v1916_v38 }
  0xb8   : > { %v524_v57 = vmax.f32 %v425_v48, 0.0  ;;  %v1987_v48 = vld [vmem:[%s1778_s12 + $0xf0] sm:$0xff] }
  0xb9   : > { %v525_v58 = vmax.f32 %v454_v49, 0.0  ;;  %2336 = vst [vmem:[#allocation11_spill] sm:$0xff] %v1987_v48  ;;  %v1990_v49 = vld [vmem:[%s1778_s12 + $0xf8] sm:$0xff] }
  0xba   : > { %2337 = vst [vmem:[#allocation12_spill] sm:$0xff] %v1990_v49 }
  0xbc   : > { %v482_v34 = vpop.f32.mrf.mxu2 }
  0xbd   : > { %v511_v35 = vpop.f32.mrf.mxu3  ;;  %v427_v36 = vpop.f32.mrf.mxu0  ;;  %v483_v21 = vadd.f32 %v482_v34, %v1916_v38  ;;  %v1944_v34 = vld [vmem:[%s1778_s12 + $0xe0] sm:$0xff] }
  0xbe   : > { %v456_v37 = vpop.f32.mrf.mxu1  ;;  %v428_v44 = vadd.f32 %v427_v36, %v1918_v39  ;;  %v512_v22 = vadd.f32 %v511_v35, %v1916_v38  ;;  %v1947_v35 = vld [vmem:[%s1778_s12 + $0xe8] sm:$0xff] }
  0xbf   : > { %v457_v45 = vadd.f32 %v456_v37, %v1918_v39  ;;  %2335 = vst [vmem:[#allocation10_spill] sm:$0xff] %v1947_v35  ;;  %v526_v37 = vmax.f32 %v483_v21, 0.0 }
  0xc0   : > { %v528_v53 = vmax.f32 %v428_v44, 0.0  ;;  %v527_v29 = vmax.f32 %v512_v22, 0.0  ;;  %v1967_v44 = vld [vmem:[%s1778_s12 + $0x68] sm:$0xff]  ;;  %v2074_v22 = vpop.permute.xlu0 %654 }
  0xc1   : > { %v529_v54 = vmax.f32 %v457_v45, 0.0  ;;  %v1972_v45 = vld [vmem:[%s2315_s3 + $0x8] sm:$0xff] }
  0xc4   : > { %v485_v40 = vpop.f32.mrf.mxu2 }
  0xc5   : > { %v514_v41 = vpop.f32.mrf.mxu3  ;;  %v430_v42 = vpop.f32.mrf.mxu0  ;;  %v486_v61 = vadd.f32 %v485_v40, %v1918_v39  ;;  %v1957_v40 = vld [vmem:[%s1778_s12 + $0xa8] sm:$0xff] }
  0xc6   : > { %v459_v43 = vpop.f32.mrf.mxu1  ;;  %v431_v46 = vadd.f32 %v430_v42, %v1914_v33  ;;  %v515_v62 = vadd.f32 %v514_v41, %v1918_v39  ;;  %v522_v41 = vmax.f32 %v480_v28, 0.0  ;;  %v523_v42 = vmax.f32 %v509_v31, 0.0 }
  0xc7   : > { %v460_v47 = vadd.f32 %v459_v43, %v1914_v33  ;;  %v530_v32 = vmax.f32 %v486_v61, 0.0  ;;  %v1964_v43 = vld [vmem:[%s1778_s12 + $0x60] sm:$0xff] }
  0xc8   : > { %v532_v50 = vmax.f32 %v431_v46, 0.0  ;;  %v531_v36 = vmax.f32 %v515_v62, 0.0  ;;  %v1979_v46 = vld [vmem:[%s1778_s12 + $0x20] sm:$0xff] }
  0xc9   : > { %v533_v51 = vmax.f32 %v460_v47, 0.0  ;;  %v1982_v47 = vld [vmem:[%s1778_s12 + $0x28] sm:$0xff] }
  0xca   : > { %564 = vmatpush.msrb.mxu0 %v532_v50  ;;  %v346_v50 = vld [vmem:[%s2316_s4] sm:$0xff] }
  0xcb   : > { %587 = vmatpush.msrb.mxu1 %v533_v51  ;;  %v2002_v51 = vld [vmem:[%s1778_s12 + $0xb0] sm:$0xff]  ;;  %538 = vperm.xlu2 %1503, %v346_v50  }
  0xcc   : > { %v488_v59 = vpop.f32.mrf.mxu2  ;;  %565 = vmatpush.msrb.mxu0 %v528_v53  ;;  %2338 = vst [vmem:[#allocation13_spill] sm:$0xff] %v2002_v51  ;;  %v2005_v53 = vld [vmem:[%s1778_s12 + $0xb8] sm:$0xff] }
  0xcd   : > { %v517_v60 = vpop.f32.mrf.mxu3  ;;  %588 = vmatpush.msrb.mxu1 %v529_v54  ;;  %v489_v63 = vadd.f32 %v488_v59, %v1914_v33  ;;  %2339 = vst [vmem:[#allocation14_spill] sm:$0xff] %v2005_v53  ;;  %v2012_v54 = vld [vmem:[%s1778_s12 + $0x70] sm:$0xff] }
  0xce   : > { %v518_v0 = vadd.f32 %v517_v60, %v1914_v33  ;;  %566 = vmatpush.msrb.mxu0 %v524_v57  ;;  %2340 = vst [vmem:[#allocation15_spill] sm:$0xff] %v2012_v54  ;;  %v2025_v57 = vld [vmem:[%s1778_s12 + $0x38] sm:$0xff]  ;;  %s354_s12 = sld [smem:[#allocation2]] }
  0xcf   : > { %589 = vmatpush.msrb.mxu1 %v525_v58  ;;  %v534_v24 = vmax.f32 %v489_v63, 0.0  ;;  %2343 = vst [vmem:[#allocation18_spill] sm:$0xff] %v2025_v57  ;;  %v347_v58 = vld [vmem:[%s2316_s4 + $0x8] sm:$0xff] }
  0xd0   : > { %v535_v25 = vmax.f32 %v518_v0, 0.0  ;;  %567 = vmatpush.msrb.mxu0 %v520_v18 }
  0xd1   : > { %590 = vmatpush.msrb.mxu1 %v521_v19  ;;  %610 = vmatpush.msrb.mxu2 %v534_v24 }
  0xd2   : > { %633 = vmatpush.msrb.mxu3 %v535_v25  ;;  %1354 = vmatmul.msk.f32.vlgmr.msrb.gmra.mxu0 %vm391_vm0, %v1939_v27 }
  0xd3   : > { %1356 = vmatmul.msk.f32.vlgmr.msrb.gmra.mxu1 %vm391_vm0, %v1939_v27  ;;  %611 = vmatpush.msrb.mxu2 %v530_v32 }
  0xd4   : > { %634 = vmatpush.msrb.mxu3 %v531_v36  ;;  %840 = vmatpush.msra.mxu0 %v1944_v34 }
  0xd5   : > { %869 = vmatpush.msra.mxu1 %v1947_v35  ;;  %612 = vmatpush.msrb.mxu2 %v526_v37 }
  0xd6   : > { %635 = vmatpush.msrb.mxu3 %v527_v29  ;;  %841 = vmatpush.msra.mxu0 %v1954_v30 }
  0xd7   : > { %870 = vmatpush.msra.mxu1 %v1957_v40  ;;  %613 = vmatpush.msrb.mxu2 %v522_v41 }
  0xd8   : > { %636 = vmatpush.msrb.mxu3 %v523_v42  ;;  %1358 = vmatmul.msk.f32.vlgmr.msrb.gmra.mxu2 %vm391_vm0, %v1939_v27 }
  0xd9   : > { %1360 = vmatmul.msk.f32.vlgmr.msrb.gmra.mxu3 %vm391_vm0, %v1939_v27  ;;  %842 = vmatpush.msra.mxu0 %v1964_v43 }
  0xda   : > { %871 = vmatpush.msra.mxu1 %v1967_v44  ;;  %1355 = vmatmul.msk.f32.gmra.mxu0 %vm391_vm0, %v1972_v45 }
  0xdb   : > { %1357 = vmatmul.msk.f32.gmra.mxu1 %vm391_vm0, %v1972_v45  ;;  %843 = vmatpush.msra.mxu0 %v1979_v46 }
  0xdc   : > { %872 = vmatpush.msra.mxu1 %v1982_v47  ;;  %898 = vmatpush.msra.mxu2 %v1987_v48 }
  0xdd   : > { %927 = vmatpush.msra.mxu3 %v1990_v49  ;;  %543 = vperm.xlu2 %1503, %v347_v58  }
  0xde   : > { %899 = vmatpush.msra.mxu2 %v2002_v51 }
  0xdf   : > { %928 = vmatpush.msra.mxu3 %v2005_v53 }
  0xe0   : > { %1359 = vmatmul.msk.f32.gmra.mxu2 %vm391_vm0, %v1972_v45 }
  0xe1   : > { %1361 = vmatmul.msk.f32.gmra.mxu3 %vm391_vm0, %v1972_v45  ;;  %900 = vmatpush.msra.mxu2 %v2012_v54 }
  0xe2   : > { %929 = vmatpush.msra.mxu3 %v2015_v55  ;;  %1382 = vmatmul.msk.f32.vlgmr.msra.gmra.mxu0 %vm391_vm0, %v1855_v17  ;;  %v2094_v55 = vstv %s354_s12 }
  0xe3   : > { %1386 = vmatmul.msk.f32.vlgmr.msra.gmra.mxu1 %vm391_vm0, %v1855_v17  ;;  %901 = vmatpush.msra.mxu2 %v2022_v56 }
  0xe4   : > { %930 = vmatpush.msra.mxu3 %v2025_v57 }
  0xe8   : > { %1390 = vmatmul.msk.f32.vlgmr.msra.gmra.mxu2 %vm391_vm0, %v1855_v17 }
  0xe9   : > { %1394 = vmatmul.msk.f32.vlgmr.msra.gmra.mxu3 %vm391_vm0, %v1855_v17 }
  0xea   : > { %1383 = vmatmul.msk.f32.gmra.mxu0 %vm391_vm0, %v1872_v20 }
  0xeb   : > { %1387 = vmatmul.msk.f32.gmra.mxu1 %vm391_vm0, %v1872_v20 }
  0xf0   : > { %1391 = vmatmul.msk.f32.gmra.mxu2 %vm391_vm0, %v1872_v20 }
  0xf1   : > { %1395 = vmatmul.msk.f32.gmra.mxu3 %vm391_vm0, %v1872_v20 }
  0xf2   : > { %1384 = vmatmul.msk.f32.gmra.mxu0 %vm391_vm0, %v1885_v23 }
  0xf3   : > { %1388 = vmatmul.msk.f32.gmra.mxu1 %vm391_vm0, %v1885_v23 }
  0xf8   : > { %1392 = vmatmul.msk.f32.gmra.mxu2 %vm391_vm0, %v1885_v23 }
  0xf9   : > { %1396 = vmatmul.msk.f32.gmra.mxu3 %vm391_vm0, %v1885_v23 }
  0xfa   : > { %1385 = vmatmul.msk.f32.gmra.mxu0 %vm391_vm0, %v1904_v26 }
  0xfb   : > { %1389 = vmatmul.msk.f32.gmra.mxu1 %vm391_vm0, %v1904_v26 }
 0x100   : > { %1393 = vmatmul.msk.f32.gmra.mxu2 %vm391_vm0, %v1904_v26 }
 0x101   : > { %1397 = vmatmul.msk.f32.gmra.mxu3 %vm391_vm0, %v1904_v26  ;;  %v2076_v26 = vpop.permute.xlu1 %659 }
 0x125   : > { %v2066_v17 = vpop.permute.xlu2 %538 }
 0x137   : > { %v2070_v61 = vpop.permute.xlu2 %543 }
 0x14f   : > { %v569_v20 = vpop.f32.mrf.mxu0 }
 0x150   : > { %v592_v59 = vpop.f32.mrf.mxu1  ;;  %v570_v60 = vadd.f32 %v569_v20, %v2066_v17 }
 0x151   : > { %v593_v23 = vadd.f32 %v592_v59, %v2066_v17 }
 0x152   : > { %v644_v0 = vmax.f32 %v570_v60, 0.0 }
 0x153   : > { %v645_v18 = vmax.f32 %v593_v23, 0.0 }
 0x154   : > { %v662_v32 = vmul.f32 %v2074_v22, %v644_v0 }
 0x155   : > { %v663_v36 = vmul.f32 %v2074_v22, %v645_v18 }
 0x157   : > { %v572_v62 = vpop.f32.mrf.mxu0 }
 0x158   : > { %v595_v63 = vpop.f32.mrf.mxu1  ;;  %v573_v19 = vadd.f32 %v572_v62, %v2070_v61 }
 0x159   : > { %v596_v21 = vadd.f32 %v595_v63, %v2070_v61 }
 0x15a   : > { %v648_v24 = vmax.f32 %v573_v19, 0.0 }
 0x15b   : > { %v649_v25 = vmax.f32 %v596_v21, 0.0  ;;  %v615_v28 = vpop.f32.mrf.mxu2 }
 0x15c   : > { %v638_v31 = vpop.f32.mrf.mxu3  ;;  %v666_v37 = vmul.f32 %v2076_v26, %v648_v24  ;;  %v616_v50 = vadd.f32 %v615_v28, %v2066_v17 }
 0x15d   : > { %v667_v29 = vmul.f32 %v2076_v26, %v649_v25  ;;  %v639_v58 = vadd.f32 %v638_v31, %v2066_v17 }
 0x15e   : > { %v670_v41 = vadd.f32 %v666_v37, %v662_v32  ;;  %v646_v0 = vmax.f32 %v616_v50, 0.0 }
 0x15f   : > { %v677_v42 = vadd.f32 %v667_v29, %v663_v36  ;;  %v2084_v20 = vpop.f32.mrf.mxu0  ;;  %v647_v18 = vmax.f32 %v639_v58, 0.0 }
 0x160   : > { %v2086_v59 = vpop.f32.mrf.mxu1  ;;  %v671_v60 = vrot.slane %v670_v41, 4  ;;  %v664_v49 = vmul.f32 %v2074_v22, %v646_v0 }
 0x161   : > { %v678_v23 = vrot.slane %v677_v42, 4  ;;  %v665_v53 = vmul.f32 %v2074_v22, %v647_v18 }
 0x162   : > { %v672_v62 = vadd.f32 %v671_v60, %v670_v41 }
 0x163   : > { %v679_v63 = vadd.f32 %v678_v23, %v677_v42  ;;  %v618_v19 = vpop.f32.mrf.mxu2 }
 0x164   : > { %v641_v21 = vpop.f32.mrf.mxu3  ;;  %v673_v24 = vrot.slane %v672_v62, 2  ;;  %v619_v32 = vadd.f32 %v618_v19, %v2070_v61 }
 0x165   : > { %v680_v25 = vrot.slane %v679_v63, 2  ;;  %v642_v28 = vadd.f32 %v641_v21, %v2070_v61 }
 0x166   : > { %v674_v31 = vadd.f32 %v673_v24, %v672_v62  ;;  %v650_v37 = vmax.f32 %v619_v32, 0.0 }
 0x167   : > { %v681_v36 = vadd.f32 %v680_v25, %v679_v63  ;;  %v651_v29 = vmax.f32 %v642_v28, 0.0  ;;  %v848_v41 = vpop.f32.mrf.mxu0 }
 0x168   : > { %v877_v42 = vpop.f32.mrf.mxu1  ;;  %v675_v50 = vrot.slane %v674_v31, 1  ;;  %v668_v60 = vmul.f32 %v2076_v26, %v650_v37 }
 0x169   : > { %v682_v58 = vrot.slane %v681_v36, 1  ;;  %v669_v23 = vmul.f32 %v2076_v26, %v651_v29 }
 0x16a   : > { %v676_v19 = vadd.f32 %v675_v50, %v674_v31  ;;  %v684_v62 = vadd.f32 %v668_v60, %v664_v49 }
 0x16b   : > { %v683_v21 = vadd.f32 %v682_v58, %v681_v36  ;;  %v691_v63 = vadd.f32 %v669_v23, %v665_v53  ;;  %v2096_v24 = vpop.f32.mrf.mxu2 }
 0x16c   : > { %v2098_v25 = vpop.f32.mrf.mxu3  ;;  %v699_v0 = vadd.f32 %v2094_v55, %v676_v19  ;;  %v685_v32 = vrot.slane %v684_v62, 4 }
 0x16d   : > { %v700_v18 = vadd.f32 %v2094_v55, %v683_v21  ;;  %v692_v28 = vrot.slane %v691_v63, 4 }
 0x16e   : > { %v1362_v57 = vmul.f32 -1.442695, %v699_v0  ;;  %v686_v48 = vadd.f32 %v685_v32, %v684_v62 }
 0x16f   : > { %v1363_v37 = vmul.f32 -1.442695, %v700_v18  ;;  %v693_v29 = vadd.f32 %v692_v28, %v691_v63  ;;  %v851_v51 = vpop.f32.mrf.mxu0 }
 0x170   : > { %v880_v54 = vpop.f32.mrf.mxu1  ;;  %1504 = vpow2.f32 %v1362_v57  ;;  %v687_v31 = vrot.slane %v686_v48, 2 }
 0x171   : > { %v694_v49 = vrot.slane %v693_v29, 2  ;;  %1506 = vpow2.f32 %v1363_v37  ;;  %v852_v37 = vadd.f32 %v851_v51, %v1918_v39  ;;  %v878_v51 = vadd.f32 %v877_v42, %v1916_v38 }
 0x172   : > { %v688_v53 = vadd.f32 %v687_v31, %v686_v48 }
 0x173   : > { %v695_v36 = vadd.f32 %v694_v49, %v693_v29  ;;  %v906_v50 = vpop.f32.mrf.mxu2 }
 0x174   : > { %v2102_v58 = vpop.f32.mrf.mxu3  ;;  %v689_v60 = vrot.slane %v688_v53, 1  ;;  %v2128_v42 = vadd.f32 %v906_v50, %v1916_v38 }
 0x175   : > { %v696_v23 = vrot.slane %v695_v36, 1 }
 0x176   : > { %v1505_v19 = vpop.eup %1504  ;;  %v690_v21 = vadd.f32 %v689_v60, %v688_v53  ;;  %v881_v60 = vadd.f32 %v880_v54, %v1918_v39 }
 0x177   : > { %v697_v56 = vadd.f32 %v696_v23, %v695_v36  ;;  %v1507_v0 = vpop.eup %1506  ;;  %v2104_v18 = vadd.f32 1.0, %v1505_v19  ;;  %v854_v62 = vpop.f32.mrf.mxu0  ;;  %v849_v36 = vadd.f32 %v848_v41, %v1916_v38  ;;  %v846_v19 = vadd.f32 %v2084_v20, %v1926_v52 }
 0x178   : > { %v2106_v63 = vadd.f32 1.0, %v1507_v0  ;;  %v701_v57 = vadd.f32 %v2094_v55, %v690_v21  ;;  %v855_v48 = vadd.f32 %v854_v62, %v1914_v33  ;;  %v883_v28 = vpop.f32.mrf.mxu1  ;;  %v875_v21 = vadd.f32 %v2086_v59, %v1926_v52 }
 0x179   : > { %v702_v32 = vadd.f32 %v2094_v55, %v697_v56  ;;  %1508 = vrcp.f32 %v2104_v18  ;;  %v884_v56 = vadd.f32 %v883_v28, %v1914_v33  ;;  %v952_v0 = vmax.f32 %v852_v37, 0.0 }
 0x17a   : > { %1510 = vrcp.f32 %v2106_v63  ;;  %v1364_v29 = vmul.f32 -1.442695, %v701_v57  ;;  %v956_v23 = vmax.f32 %v855_v48, 0.0  ;;  %v953_v48 = vmax.f32 %v881_v60, 0.0 }
 0x17b   : > { %v1365_v31 = vmul.f32 -1.442695, %v702_v32  ;;  %v909_v49 = vpop.f32.mrf.mxu2  ;;  %v957_v62 = vmax.f32 %v884_v56, 0.0  ;;  %v948_v32 = vmax.f32 %v849_v36, 0.0  ;;  %v944_v28 = vmax.f32 %v846_v19, 0.0 }
 0x17c   : > { %v2114_v53 = vpop.f32.mrf.mxu3  ;;  %1512 = vpow2.f32 %v1364_v29  ;;  %972 = vmatpush.msrb.mxu0 %v956_v23  ;;  %v945_v35 = vmax.f32 %v875_v21, 0.0  ;;  %v730_v29 = vand.u32 2147483648, %v2104_v18  ;;  %vm724_vm1 = vweird.f32 %v2104_v18 }
 0x17d   : > { %1514 = vpow2.f32 %v1365_v31  ;;  %995 = vmatpush.msrb.mxu1 %v957_v62  ;;  %v949_v31 = vmax.f32 %v878_v51, 0.0  ;;  %v728_v36 = vand.u32 2147483647, %v2104_v18  ;;  %vm739_vm2 = vweird.f32 %v2106_v63 }
 0x17e   : > { %973 = vmatpush.msrb.mxu0 %v952_v0  ;;  %v745_v21 = vand.u32 2147483648, %v2106_v63 }
 0x17f   : > { %v1509_v57 = vpop.eup %1508  ;;  %996 = vmatpush.msrb.mxu1 %v953_v48  ;;  %v731_v48 = vor.u32 1.1754944e-38, %v730_v29  ;;  %vm729_vm6 = vcmp.eq.f32.partialorder %v728_v36, 8.507059e+37 }
 0x180   : > { %v1511_v41 = vpop.eup %1510  ;;  %v720_v54 = vmul.f32 %v1509_v57, %v2104_v18  ;;  %974 = vmatpush.msrb.mxu0 %v948_v32  ;;  %vm725_vm3 = vweird.f32 %v1509_v57  ;;  %v936_v18 = vadd.f32 %v2102_v58, %v1916_v38 }
 0x181   : > { %v735_v20 = vmul.f32 %v1511_v41, %v2106_v63  ;;  %997 = vmatpush.msrb.mxu1 %v949_v31  ;;  %vm740_vm4 = vweird.f32 %v1511_v41  ;;  %vm726_vm5 = vmor %vm724_vm1, %vm725_vm3 }
 0x182   : > { %v721_v59 = vsub.f32 1.0, %v720_v54  ;;  %v1513_v37 = vpop.eup %1512  ;;  %975 = vmatpush.msrb.mxu0 %v944_v28  ;;  %vm741_vm7 = vmor %vm739_vm2, %vm740_vm4 }
 0x183   : > { %v736_v60 = vsub.f32 1.0, %v735_v20  ;;  %v912_v23 = vpop.f32.mrf.mxu2  ;;  %v1515_v56 = vpop.eup %1514  ;;  %v2134_v51 = vadd.f32 1.0, %v1513_v37  ;;  %1398 = vmatmul.msk.f32.vlgmr.msrb.gmra.mxu0 %vm391_vm0, %v1939_v27  ;;  %v743_v20 = vand.u32 2147483647, %v2106_v63  ;;  %998 = vmatpush.msrb.mxu1 %v945_v35  ;;  %v746_v35 = vor.u32 1.1754944e-38, %v745_v21 }
 0x184   : > { %v722_v19 = vmul.f32 %v1509_v57, %v721_v59  ;;  %v941_v50 = vpop.f32.mrf.mxu3  ;;  %v2136_v62 = vadd.f32 1.0, %v1515_v56  ;;  %v913_v54 = vadd.f32 %v912_v23, %v1914_v33  ;;  %v910_v59 = vadd.f32 %v909_v49, %v1918_v39  ;;  %1400 = vmatmul.msk.f32.vlgmr.msrb.gmra.mxu1 %vm391_vm0, %v1939_v27 }
 0x185   : > { %v737_v0 = vmul.f32 %v1511_v41, %v736_v60  ;;  %1516 = vrcp.f32 %v2134_v51  ;;  %v942_v31 = vadd.f32 %v941_v50, %v1914_v33  ;;  %v939_v49 = vadd.f32 %v2114_v53, %v1918_v39 }
 0x186   : > { %v723_v32 = vadd.f32 %v1509_v57, %v722_v19  ;;  %1518 = vrcp.f32 %v2136_v62  ;;  %v958_v33 = vmax.f32 %v913_v54, 0.0  ;;  %vm744_vm8 = vcmp.eq.f32.partialorder %v743_v20, 8.507059e+37 }
 0x187   : > { %v738_v28 = vadd.f32 %v1511_v41, %v737_v0  ;;  %v954_v19 = vmax.f32 %v910_v59, 0.0  ;;  %v959_v21 = vmax.f32 %v942_v31, 0.0  ;;  %v955_v53 = vmax.f32 %v939_v49, 0.0 }
 0x188   : > { %v727_v29 = vsel %vm726_vm5, %v1509_v57, %v723_v32  ;;  %1018 = vmatpush.msrb.mxu2 %v958_v33  ;;  %v758_v54 = vand.u32 2147483647, %v2134_v51  ;;  %vm754_vm11 = vweird.f32 %v2134_v51  ;;  %vm769_vm13 = vweird.f32 %v2136_v62 }
 0x189   : > { %v732_v37 = vsel %vm729_vm6, %v731_v48, %v727_v29  ;;  %v742_v60 = vsel %vm741_vm7, %v1511_v41, %v738_v28  ;;  %1041 = vmatpush.msrb.mxu3 %v959_v21  ;;  %v775_v48 = vand.u32 2147483648, %v2136_v62  ;;  %v773_v28 = vand.u32 2147483647, %v2136_v62 }
 0x18a   : > { %v779_v23 = vmul.f32 %v732_v37, %v1834_v13  ;;  %v783_v57 = vmul.f32 %v732_v37, %v1817_v9  ;;  %v787_v36 = vmul.f32 %v732_v37, %v1803_v5  ;;  %v791_v63 = vmul.f32 %v732_v37, %v1789_v1  ;;  %1019 = vmatpush.msrb.mxu2 %v954_v19 }
 0x18b   : > { %v747_v56 = vsel %vm744_vm8, %v746_v35, %v742_v60  ;;  %v1517_v38 = vpop.eup %1516  ;;  %v904_v5 = vadd.f32 %v2096_v24, %v1926_v52  ;;  %v933_v1 = vadd.f32 %v2098_v25, %v1926_v52  ;;  %v950_v24 = vmax.f32 %v2128_v42, 0.0  ;;  %1399 = vmatmul.msk.f32.gmra.mxu0 %vm391_vm0, %v1972_v45  ;;  %1042 = vmatpush.msrb.mxu3 %v955_v53 }
 0x18c   : > { %795 = vst [vmem:[%s2164_s14] sm:$0xff] %v779_v23  ;;  %v780_v9 = vmul.f32 %v747_v56, %v1837_v14  ;;  %v1519_v13 = vpop.eup %1518  ;;  %v784_v39 = vmul.f32 %v747_v56, %v1823_v10  ;;  %v750_v58 = vmul.f32 %v1517_v38, %v2134_v51  ;;  %v788_v14 = vmul.f32 %v747_v56, %v1806_v6 }
 0x18d   : > { %799 = vst [vmem:[%s2164_s14 + $0x40] sm:$0xff] %v783_v57  ;;  %v765_v41 = vmul.f32 %v1519_v13, %v2136_v62  ;;  %v792_v10 = vmul.f32 %v747_v56, %v1792_v2  ;;  %v951_v25 = vmax.f32 %v936_v18, 0.0  ;;  %1401 = vmatmul.msk.f32.gmra.mxu1 %vm391_vm0, %v1972_v45  ;;  %v760_v6 = vand.u32 2147483648, %v2134_v51  ;;  %1020 = vmatpush.msrb.mxu2 %v950_v24 }
 0x18e   : > { %803 = vst [vmem:[%s2164_s14 + $0x80] sm:$0xff] %v787_v36  ;;  %v751_v52 = vsub.f32 1.0, %v750_v58  ;;  %v946_v0 = vmax.f32 %v904_v5, 0.0  ;;  %vm755_vm9 = vweird.f32 %v1517_v38  ;;  %v947_v2 = vmax.f32 %v933_v1, 0.0 }
 0x18f   : > { %807 = vst [vmem:[%s2164_s14 + $0xc0] sm:$0xff] %v791_v63  ;;  %v766_v50 = vsub.f32 1.0, %v765_v41  ;;  %1043 = vmatpush.msrb.mxu3 %v951_v25  ;;  %vm770_vm10 = vweird.f32 %v1519_v13  ;;  %vm756_vm12 = vmor %vm754_vm11, %vm755_vm9  ;;  %v761_v59 = vor.u32 1.1754944e-38, %v760_v6  ;;  %vm759_vm14 = vcmp.eq.f32.partialorder %v758_v54, 8.507059e+37 }
 0x190   : > { %796 = vst [vmem:[%s2164_s14 + $0x8] sm:$0xff] %v780_v9  ;;  %v752_v42 = vmul.f32 %v1517_v38, %v751_v52  ;;  %1021 = vmatpush.msrb.mxu2 %v946_v0  ;;  %vm771_vm15 = vmor %vm769_vm13, %vm770_vm10  ;;  %v776_v18 = vor.u32 1.1754944e-38, %v775_v48  ;;  %vm774_vm1 = vcmp.eq.f32.partialorder %v773_v28, 8.507059e+37 }
 0x191   : > { %800 = vst [vmem:[%s2164_s14 + $0x48] sm:$0xff] %v784_v39  ;;  %v767_v32 = vmul.f32 %v1519_v13, %v766_v50  ;;  %1044 = vmatpush.msrb.mxu3 %v947_v2  ;;  %1402 = vmatmul.msk.f32.vlgmr.msrb.gmra.mxu2 %vm391_vm0, %v1939_v27 }
 0x192   : > { %804 = vst [vmem:[%s2164_s14 + $0x88] sm:$0xff] %v788_v14  ;;  %v753_v20 = vadd.f32 %v1517_v38, %v752_v42  ;;  %1404 = vmatmul.msk.f32.vlgmr.msrb.gmra.mxu3 %vm391_vm0, %v1939_v27 }
 0x193   : > { %808 = vst [vmem:[%s2164_s14 + $0xc8] sm:$0xff] %v792_v10  ;;  %v768_v31 = vadd.f32 %v1519_v13, %v767_v32 }
 0x194   : > { %v757_v29 = vsel %vm756_vm12, %v1517_v38, %v753_v20 }
 0x195   : > { %v762_v51 = vsel %vm759_vm14, %v761_v59, %v757_v29  ;;  %v772_v35 = vsel %vm771_vm15, %v1519_v13, %v768_v31 }
 0x196   : > { %v781_v37 = vmul.f32 %v762_v51, %v1842_v15  ;;  %v785_v60 = vmul.f32 %v762_v51, %v1826_v11  ;;  %v789_v62 = vmul.f32 %v762_v51, %v1811_v7  ;;  %v793_v27 = vmul.f32 %v762_v51, %v1795_v3 }
 0x197   : > { %v777_v49 = vsel %vm774_vm1, %v776_v18, %v772_v35 }
 0x198   : > { %797 = vst [vmem:[%s2164_s14 + $0x10] sm:$0xff] %v781_v37  ;;  %v782_v33 = vmul.f32 %v777_v49, %v1845_v16  ;;  %v786_v23 = vmul.f32 %v777_v49, %v1829_v12  ;;  %v790_v15 = vmul.f32 %v777_v49, %v1814_v8  ;;  %v794_v7 = vmul.f32 %v777_v49, %v1800_v4 }
 0x199   : > { %801 = vst [vmem:[%s2164_s14 + $0x50] sm:$0xff] %v785_v60  ;;  %1403 = vmatmul.msk.f32.gmra.mxu2 %vm391_vm0, %v1972_v45 }
 0x19a   : > { %805 = vst [vmem:[%s2164_s14 + $0x90] sm:$0xff] %v789_v62  ;;  %1405 = vmatmul.msk.f32.gmra.mxu3 %vm391_vm0, %v1972_v45 }
 0x19b   : > { %809 = vst [vmem:[%s2164_s14 + $0xd0] sm:$0xff] %v793_v27 }
 0x19c   : > { %798 = vst [vmem:[%s2164_s14 + $0x18] sm:$0xff] %v782_v33 }
 0x19d   : > { %802 = vst [vmem:[%s2164_s14 + $0x58] sm:$0xff] %v786_v23 }
 0x19e   : > { %806 = vst [vmem:[%s2164_s14 + $0x98] sm:$0xff] %v790_v15 }
 0x19f   : > { %810 = vst [vmem:[%s2164_s14 + $0xd8] sm:$0xff] %v794_v7 }
 0x200   : > { %v977_v3 = vpop.f32.mrf.mxu0 }
 0x201   : > { %v1000_v11 = vpop.f32.mrf.mxu1  ;;  %v978_v12 = vadd.f32 %v977_v3, %v2066_v17 }
 0x202   : > { %v1001_v16 = vadd.f32 %v1000_v11, %v2066_v17 }
 0x203   : > { %v1052_v57 = vmax.f32 %v978_v12, 0.0 }
 0x204   : > { %v1053_v56 = vmax.f32 %v1001_v16, 0.0 }
 0x205   : > { %v1060_v21 = vmul.f32 %v1052_v57, %v2074_v22 }
 0x206   : > { %v1061_v9 = vmul.f32 %v1053_v56, %v2074_v22 }
 0x208   : > { %v980_v8 = vpop.f32.mrf.mxu0 }
 0x209   : > { %v981_v36 = vadd.f32 %v980_v8, %v2070_v61 }
 0x20a   : > { %v1003_v63 = vpop.f32.mrf.mxu1 }
 0x20b   : > { %v1004_v4 = vadd.f32 %v1003_v63, %v2070_v61  ;;  %v1056_v19 = vmax.f32 %v981_v36, 0.0 }
 0x20d   : > { %v1057_v45 = vmax.f32 %v1004_v4, 0.0  ;;  %v1064_v38 = vmul.f32 %v1056_v19, %v2076_v26 }
 0x20f   : > { %v1065_v5 = vmul.f32 %v1057_v45, %v2076_v26  ;;  %v1068_v1 = vadd.f32 %v1064_v38, %v1060_v21 }
 0x211   : > { %v1075_v13 = vadd.f32 %v1065_v5, %v1061_v9  ;;  %v1069_v39 = vrot.slane %v1068_v1, 4 }
 0x213   : > { %v1076_v58 = vrot.slane %v1075_v13, 4  ;;  %v1070_v53 = vadd.f32 %v1069_v39, %v1068_v1 }
 0x214   : > { %v1023_v14 = vpop.f32.mrf.mxu2 }
 0x215   : > { %v1077_v41 = vadd.f32 %v1076_v58, %v1075_v13  ;;  %v1046_v24 = vpop.f32.mrf.mxu3  ;;  %v1071_v10 = vrot.slane %v1070_v53, 2  ;;  %v1024_v50 = vadd.f32 %v1023_v14, %v2066_v17 }
 0x216   : > { %v1047_v42 = vadd.f32 %v1046_v24, %v2066_v17 }
 0x217   : > { %v1078_v52 = vrot.slane %v1077_v41, 2  ;;  %v1072_v25 = vadd.f32 %v1071_v10, %v1070_v53  ;;  %v1054_v20 = vmax.f32 %v1024_v50, 0.0 }
 0x218   : > { %v1055_v29 = vmax.f32 %v1047_v42, 0.0 }
 0x219   : > { %v1079_v6 = vadd.f32 %v1078_v52, %v1077_v41  ;;  %v1073_v0 = vrot.slane %v1072_v25, 1  ;;  %v1062_v17 = vmul.f32 %v1054_v20, %v2074_v22 }
 0x21a   : > { %v1063_v49 = vmul.f32 %v1055_v29, %v2074_v22 }
 0x21b   : > { %v1080_v54 = vrot.slane %v1079_v6, 1  ;;  %v1074_v2 = vadd.f32 %v1073_v0, %v1072_v25 }
 0x21c   : > { %v1026_v32 = vpop.f32.mrf.mxu2 }
 0x21d   : > { %v1081_v48 = vadd.f32 %v1080_v54, %v1079_v6  ;;  %v1027_v28 = vadd.f32 %v1026_v32, %v2070_v61  ;;  %v1049_v59 = vpop.f32.mrf.mxu3  ;;  %v1096_v31 = vadd.f32 %v1074_v2, %v2094_v55 }
 0x21e   : > { %v1050_v51 = vadd.f32 %v1049_v59, %v2070_v61 }
 0x21f   : > { %v1097_v35 = vadd.f32 %v1081_v48, %v2094_v55  ;;  %v1058_v18 = vmax.f32 %v1027_v28, 0.0  ;;  %v1406_v37 = vmul.f32 -1.442695, %v1096_v31 }
 0x220   : > { %v1059_v60 = vmax.f32 %v1050_v51, 0.0 }
 0x221   : > { %v1407_v62 = vmul.f32 -1.442695, %v1097_v35  ;;  %v1066_v27 = vmul.f32 %v1058_v18, %v2076_v26  ;;  %1520 = vpow2.f32 %v1406_v37  ;;  %v2344_v37 = vld [vmem:[#allocation10_spill] sm:$0xff] }
 0x222   : > { %v1067_v33 = vmul.f32 %v1059_v60, %v2076_v26 }
 0x223   : > { %1522 = vpow2.f32 %v1407_v62  ;;  %v1082_v23 = vadd.f32 %v1066_v27, %v1062_v17 }
 0x224   : > { %v1089_v15 = vadd.f32 %v1067_v33, %v1063_v49 }
 0x225   : > { %v1083_v7 = vrot.slane %v1082_v23, 4 }
 0x226   : > { %v1090_v61 = vrot.slane %v1089_v15, 4 }
 0x227   : > { %v1084_v3 = vadd.f32 %v1083_v7, %v1082_v23  ;;  %v1521_v11 = vpop.eup %1520 }
 0x228   : > { %v1091_v12 = vadd.f32 %v1090_v61, %v1089_v15  ;;  %v1112_v8 = vadd.f32 1.0, %v1521_v11 }
 0x229   : > { %v1523_v16 = vpop.eup %1522  ;;  %v1085_v57 = vrot.slane %v1084_v3, 2 }
 0x22a   : > { %v1113_v36 = vadd.f32 1.0, %v1523_v16  ;;  %v1092_v63 = vrot.slane %v1091_v12, 2  ;;  %1524 = vrcp.f32 %v1112_v8  ;;  %v1127_v58 = vand.u32 2147483648, %v1112_v8 }
 0x22b   : > { %v1086_v56 = vadd.f32 %v1085_v57, %v1084_v3  ;;  %v1125_v10 = vand.u32 2147483647, %v1112_v8  ;;  %vm1121_vm3 = vweird.f32 %v1112_v8 }
 0x22c   : > { %1526 = vrcp.f32 %v1113_v36  ;;  %v1093_v4 = vadd.f32 %v1092_v63, %v1091_v12  ;;  %v1142_v25 = vand.u32 2147483648, %v1113_v36  ;;  %v1140_v50 = vand.u32 2147483647, %v1113_v36 }
 0x22d   : > { %v1087_v22 = vrot.slane %v1086_v56, 1  ;;  %v1128_v0 = vor.u32 1.1754944e-38, %v1127_v58  ;;  %vm1136_vm5 = vweird.f32 %v1113_v36  ;;  %vm1126_vm6 = vcmp.eq.f32.partialorder %v1125_v10, 8.507059e+37  ;;  %v2352_v58 = vld [vmem:[#allocation12_spill] sm:$0xff] }
 0x22e   : > { %v1094_v19 = vrot.slane %v1093_v4, 1  ;;  %v1143_v32 = vor.u32 1.1754944e-38, %v1142_v25  ;;  %vm1141_vm8 = vcmp.eq.f32.partialorder %v1140_v50, 8.507059e+37 }
 0x22f   : > { %v1088_v45 = vadd.f32 %v1087_v22, %v1086_v56  ;;  %v2346_v56 = vld [vmem:[#allocation15_spill] sm:$0xff]  ;;  %v2347_v22 = vld [vmem:[#allocation13_spill] sm:$0xff] }
 0x230   : > { %v1525_v26 = vpop.eup %1524  ;;  %v1095_v21 = vadd.f32 %v1094_v19, %v1093_v4 }
 0x231   : > { %v1117_v9 = vmul.f32 %v1525_v26, %v1112_v8  ;;  %v1098_v1 = vadd.f32 %v1088_v45, %v2094_v55  ;;  %vm1122_vm0 = vweird.f32 %v1525_v26 }
 0x232   : > { %v1527_v38 = vpop.eup %1526  ;;  %v1099_v13 = vadd.f32 %v1095_v21, %v2094_v55  ;;  %vm1123_vm4 = vmor %vm1121_vm3, %vm1122_vm0 }
 0x233   : > { %v1132_v5 = vmul.f32 %v1527_v38, %v1113_v36  ;;  %v1118_v39 = vsub.f32 1.0, %v1117_v9  ;;  %v1408_v14 = vmul.f32 -1.442695, %v1098_v1  ;;  %vm1137_vm2 = vweird.f32 %v1527_v38  ;;  %v2345_v36 = vld [vmem:[#allocation17_spill] sm:$0xff] }
 0x234   : > { %v1409_v41 = vmul.f32 -1.442695, %v1099_v13  ;;  %vm1138_vm7 = vmor %vm1136_vm5, %vm1137_vm2  ;;  %v2351_v13 = vld [vmem:[#allocation14_spill] sm:$0xff] }
 0x235   : > { %v1133_v53 = vsub.f32 1.0, %v1132_v5  ;;  %v1119_v24 = vmul.f32 %v1525_v26, %v1118_v39  ;;  %1528 = vpow2.f32 %v1408_v14  ;;  %v2350_v5 = vld [vmem:[#allocation16_spill] sm:$0xff] }
 0x236   : > { %1530 = vpow2.f32 %v1409_v41 }
 0x237   : > { %v1134_v52 = vmul.f32 %v1527_v38, %v1133_v53  ;;  %v1120_v6 = vadd.f32 %v1525_v26, %v1119_v24 }
 0x239   : > { %v1135_v42 = vadd.f32 %v1527_v38, %v1134_v52  ;;  %v1124_v55 = vsel %vm1123_vm4, %v1525_v26, %v1120_v6  ;;  %v2348_v26 = vld [vmem:[#allocation11_spill] sm:$0xff] }
 0x23a   : > { %v1129_v54 = vsel %vm1126_vm6, %v1128_v0, %v1124_v55 }
 0x23b   : > { %v1139_v2 = vsel %vm1138_vm7, %v1527_v38, %v1135_v42  ;;  %v1176_v48 = vmul.f32 %v1979_v46, %v1129_v54  ;;  %v1180_v20 = vmul.f32 %v1964_v43, %v1129_v54  ;;  %v1184_v28 = vmul.f32 %v1954_v30, %v1129_v54  ;;  %v1529_v59 = vpop.eup %1528  ;;  %v2349_v38 = vld [vmem:[#allocation18_spill] sm:$0xff] }
 0x23c   : > { %v1188_v31 = vmul.f32 %v1944_v34, %v1129_v54  ;;  %v1144_v29 = vsel %vm1141_vm8, %v1143_v32, %v1139_v2  ;;  %v1531_v51 = vpop.eup %1530  ;;  %v1114_v18 = vadd.f32 1.0, %v1529_v59 }
 0x23d   : > { %1410 = vst [vmem:[%s2164_s14 + $0x20] sm:$0xff] %v1176_v48  ;;  %v1177_v35 = vmul.f32 %v1982_v47, %v1144_v29  ;;  %v1181_v46 = vmul.f32 %v1967_v44, %v1144_v29  ;;  %v1115_v43 = vadd.f32 1.0, %v1531_v51  ;;  %v1185_v30 = vmul.f32 %v1957_v40, %v1144_v29 }
 0x23e   : > { %1414 = vst [vmem:[%s2164_s14 + $0x60] sm:$0xff] %v1180_v20  ;;  %v1189_v60 = vmul.f32 %v2344_v37, %v1144_v29  ;;  %1532 = vrcp.f32 %v1114_v18  ;;  %v1157_v44 = vand.u32 2147483648, %v1114_v18  ;;  %v1155_v40 = vand.u32 2147483647, %v1114_v18 }
 0x23f   : > { %1418 = vst [vmem:[%s2164_s14 + $0xa0] sm:$0xff] %v1184_v28  ;;  %1534 = vrcp.f32 %v1115_v43  ;;  %v1172_v15 = vand.u32 2147483648, %v1115_v43  ;;  %vm1151_vm11 = vweird.f32 %v1114_v18  ;;  %v1170_v61 = vand.u32 2147483647, %v1115_v43 }
 0x240   : > { %1422 = vst [vmem:[%s2164_s14 + $0xe0] sm:$0xff] %v1188_v31  ;;  %v1158_v3 = vor.u32 1.1754944e-38, %v1157_v44  ;;  %vm1166_vm13 = vweird.f32 %v1115_v43  ;;  %vm1156_vm14 = vcmp.eq.f32.partialorder %v1155_v40, 8.507059e+37 }
 0x241   : > { %1411 = vst [vmem:[%s2164_s14 + $0x28] sm:$0xff] %v1177_v35  ;;  %v1173_v57 = vor.u32 1.1754944e-38, %v1172_v15  ;;  %vm1171_vm1 = vcmp.eq.f32.partialorder %v1170_v61, 8.507059e+37 }
 0x242   : > { %1415 = vst [vmem:[%s2164_s14 + $0x68] sm:$0xff] %v1181_v46 }
 0x243   : > { %1419 = vst [vmem:[%s2164_s14 + $0xa8] sm:$0xff] %v1185_v30 }
 0x244   : > { %1423 = vst [vmem:[%s2164_s14 + $0xe8] sm:$0xff] %v1189_v60  ;;  %v1533_v34 = vpop.eup %1532 }
 0x245   : > { %v1535_v62 = vpop.eup %1534  ;;  %v1147_v47 = vmul.f32 %v1533_v34, %v1114_v18  ;;  %vm1152_vm9 = vweird.f32 %v1533_v34 }
 0x246   : > { %v1162_v17 = vmul.f32 %v1535_v62, %v1115_v43  ;;  %vm1167_vm10 = vweird.f32 %v1535_v62  ;;  %vm1153_vm12 = vmor %vm1151_vm11, %vm1152_vm9 }
 0x247   : > { %v1148_v27 = vsub.f32 1.0, %v1147_v47  ;;  %vm1168_vm15 = vmor %vm1166_vm13, %vm1167_vm10 }
 0x248   : > { %v1163_v49 = vsub.f32 1.0, %v1162_v17 }
 0x249   : > { %v1149_v33 = vmul.f32 %v1533_v34, %v1148_v27 }
 0x24a   : > { %v1164_v23 = vmul.f32 %v1535_v62, %v1163_v49 }
 0x24b   : > { %v1150_v7 = vadd.f32 %v1533_v34, %v1149_v33 }
 0x24c   : > { %v1165_v11 = vadd.f32 %v1535_v62, %v1164_v23 }
 0x24d   : > { %v1154_v12 = vsel %vm1153_vm12, %v1533_v34, %v1150_v7 }
 0x24e   : > { %v1159_v16 = vsel %vm1156_vm14, %v1158_v3, %v1154_v12  ;;  %v1169_v8 = vsel %vm1168_vm15, %v1535_v62, %v1165_v11 }
 0x24f   : > { %v1178_v63 = vmul.f32 %v2345_v36, %v1159_v16  ;;  %v1182_v4 = vmul.f32 %v2346_v56, %v1159_v16  ;;  %v1186_v19 = vmul.f32 %v2347_v22, %v1159_v16  ;;  %v1190_v45 = vmul.f32 %v2348_v26, %v1159_v16 }
 0x250   : > { %v1174_v21 = vsel %vm1171_vm1, %v1173_v57, %v1169_v8 }
 0x251   : > { %1412 = vst [vmem:[%s2164_s14 + $0x30] sm:$0xff] %v1178_v63  ;;  %v1179_v9 = vmul.f32 %v2349_v38, %v1174_v21  ;;  %v1183_v1 = vmul.f32 %v2350_v5, %v1174_v21  ;;  %v1187_v39 = vmul.f32 %v2351_v13, %v1174_v21  ;;  %v1191_v53 = vmul.f32 %v2352_v58, %v1174_v21 }
 0x252   : > { %1416 = vst [vmem:[%s2164_s14 + $0x70] sm:$0xff] %v1182_v4 }
 0x253   : > { %1420 = vst [vmem:[%s2164_s14 + $0xb0] sm:$0xff] %v1186_v19 }
 0x254   : > { %1424 = vst [vmem:[%s2164_s14 + $0xf0] sm:$0xff] %v1190_v45 }
 0x255   : > { %1413 = vst [vmem:[%s2164_s14 + $0x38] sm:$0xff] %v1179_v9 }
 0x256   : > { %1417 = vst [vmem:[%s2164_s14 + $0x78] sm:$0xff] %v1183_v1 }
 0x257   : > { %1421 = vst [vmem:[%s2164_s14 + $0xb8] sm:$0xff] %v1187_v39 }
 0x258   : > { %1425 = vst [vmem:[%s2164_s14 + $0xf8] sm:$0xff] %v1191_v53 }
 0x259   : > { %1593 = shalt.err (!%p1590_p0)
}
 0x25a   : > { %s1653_s10 = smov 1024   ;;  %s1654_s14 = smov 64  }
 0x25b   : > { %1436 = dma.vmem_to_hbm [thread:$0]  (%p1749_p9), %s1225_s23, 4096, %s1227_s24, %s1210_s25, %s1653_s10, %s1653_s10, %s1654_s14  }
 0x25c PF: > { %s1241_s19 = sand.u32 1, %s1628_s26   ;;  %p1443_p1 = pnand %p1329_p12, %p1756_p11 }
 0x25d   : > { %s1242_s21 = scalar_lea.sflag [#allocation5], %s1241_s19 }
 0x25e   : > { %p1444_p2 = pneg %p1443_p1 }
 0x260   : > { %1623 = dma.done.wait (%p1444_p2), %s1242_s21, 4096  }
 0x261   : > { %1625 = vsyncadd (%p1444_p2), %s1242_s21, 4294963200  ;;  %s24_s8 = sadd.s32 1, %s1648_s8   ;;  %s2353_s15 = sld [smem:[#allocation9_spill]] }
 0x262   : > { %p21_p3 = scmp.ge.s32.totalorder %s24_s8, 4   ;;  %s2354_s26 = smov %s1632_s27 }
 0x263   : > { %s2355_s27 = smov %s1636_s28  ;;  %s2356_s28 = smov %s1754_s16 }
 0x264   : > { %s2357_s29 = smov %s1644_s30  ;;  %23 = sbr.rel (!%p21_p3) target bundleno = 8 (0x8), region = 98 }
 0x267   : > { %s2358_s30 = smov %s2353_s15 }
 0x269   :  { %1248 = vsyncpa [#allocation4], 1 }
 0x26a   :  { %1250 = vsyncpa [#allocation4 + $0x1], 1 }
 0x26b   :  { %1251 = vsyncpa [#allocation5], 1 }
 0x26c   :  { %1253 = vsyncpa [#allocation5 + $0x1], 1 }

</bundles_post_ra>
